<compile_context>
chip_gen: v6e
topology: v6e:2x2x1
jax: 0.10.0
libtpu: 0.0.40
codegen_flags: <defaults>
</compile_context>

<pallas_src>
import functools

import jax
import jax.numpy as jnp
import numpy as np
from jax import lax
from jax.experimental import pallas as pl
from jax.experimental.pallas import tpu as pltpu

TEMPERATURE = 0.07
BASE_TEMPERATURE = 0.07
INV_TEMPERATURE = 1.0 / TEMPERATURE
NORM_EPS = 1e-12  # matches torch.nn.functional.normalize default eps


def _round_up(x, m):
    return (x + m - 1) // m * m


def _comp_loss_kernel(feat_ref, labels_ref, proto_ref, out_ref, *, loss_scale):
    """One batch block: accumulate the sum of positive-class log-probs."""
    i = pl.program_id(0)

    @pl.when(i == 0)
    def _init():
        out_ref[0, 0] = jnp.float32(0.0)

    labels = labels_ref[...]                                   # (1, TB) int32

    # MXU matmul in the input dtype, f32 accumulate.  Prototypes are already
    # L2-normalized and pre-scaled by 1/T, so this IS the logits tensor.
    # (C, TB) orientation keeps the batch on the 128-lane axis -> lane-dense
    # softmax/mask path even when the class count is tiny.
    logits = lax.dot_general(
        proto_ref[...], feat_ref[...],
        dimension_numbers=(((1,), (1,)), ((), ())),
        preferred_element_type=jnp.float32)                    # (C, TB)

    # Numerically stable logsumexp over classes (sublane axis).
    logits_max = jnp.max(logits, axis=0, keepdims=True)        # (1, TB)
    shifted = logits - logits_max
    lse = jnp.log(jnp.sum(jnp.exp(shifted), axis=0, keepdims=True))  # (1, TB)

    # Fused one-hot pick: the mask has exactly one 1 per valid column, so
    #   sum(mask * log_prob) == sum(mask * shifted) - lse.
    class_ids = lax.broadcasted_iota(jnp.int32, logits.shape, 0)     # (C, TB)
    mask = (labels == class_ids).astype(jnp.float32)                 # (C, TB)
    picked = jnp.sum(mask * shifted, axis=0, keepdims=True) - lse    # (1, TB)

    # Padded columns carry label -1 and contribute nothing.
    valid = (labels >= 0).astype(jnp.float32)                        # (1, TB)
    out_ref[0, 0] += jnp.sum(picked * valid)

    @pl.when(i == pl.num_programs(0) - 1)
    def _finalize():
        out_ref[0, 0] = out_ref[0, 0] * loss_scale


def comp_loss(features, prototypes, labels, *, block_b=512):
    """features: (B, D) f32/bf16, prototypes: (C, D), labels: (B,) int."""
    B, D = features.shape
    C, Dp = prototypes.shape
    assert D == Dp, (features.shape, prototypes.shape)

    feat_dtype = features.dtype
    itemsize = jnp.dtype(feat_dtype).itemsize

    # L2-normalize prototypes in f32 and fold 1/temperature into them (one
    # fused XLA pass); cast to the feature dtype so the MXU sees matched
    # operands (bf16 x bf16 -> f32 at full rate when inputs are bf16).
    proto_f32 = prototypes.astype(jnp.float32)
    norm = jnp.sqrt(jnp.sum(proto_f32 * proto_f32, axis=1, keepdims=True))
    proto_scaled = (proto_f32 / jnp.maximum(norm, NORM_EPS)
                    * INV_TEMPERATURE).astype(feat_dtype)

    # Batch tile: multiple of 128 (labels are a lane-dense (1, tb) block),
    # capped by block_b and by a VMEM target for the double-buffered feature
    # tile so we stay comfortably inside v5e/v7x budgets.
    feat_vmem_target = 32 * 1024 * 1024
    max_tb = max(128, (feat_vmem_target // (2 * D * itemsize)) // 128 * 128)
    tb = min(_round_up(B, 128), _round_up(block_b, 128), max_tb)
    b_pad = _round_up(B, tb)
    pad = b_pad - B

    feats = features
    labels_i = labels.astype(jnp.int32)
    if pad:
        feats = jnp.pad(feats, ((0, pad), (0, 0)))
        labels_i = jnp.pad(labels_i, ((0, pad),), constant_values=-1)
    labels2d = labels_i.reshape(1, b_pad)

    num_blocks = b_pad // tb
    loss_scale = -(TEMPERATURE / BASE_TEMPERATURE) / float(B)

    # Explicit scoped-VMEM limit: the 16/32 MiB defaults would otherwise cap
    # the tile size well below what the chip can pipeline at roofline.
    need = (2 * tb * D * itemsize        # double-buffered feature block
            + 2 * C * D * itemsize       # prototypes (constant index map)
            + 2 * tb * 4                 # labels block
            + (1 << 20))                 # slack
    vmem_limit = int(min(max(2 * need, 32 * 1024 * 1024), 128 * 1024 * 1024))

    cost = pl.CostEstimate(
        flops=2 * b_pad * D * C,
        transcendentals=b_pad * C,
        bytes_accessed=(b_pad * D * itemsize + C * D * itemsize
                        + b_pad * 4 + 4))

    kernel = functools.partial(_comp_loss_kernel, loss_scale=loss_scale)

    out = pl.pallas_call(
        kernel,
        out_shape=jax.ShapeDtypeStruct((1, 1), jnp.float32),
        grid=(num_blocks,),
        in_specs=[
            pl.BlockSpec((tb, D), lambda i: (i, 0)),    # features (pipelined)
            pl.BlockSpec((1, tb), lambda i: (0, i)),    # labels (lane-dense)
            pl.BlockSpec((C, D), lambda i: (0, 0)),     # prototypes (resident)
        ],
        # Scalar loss accumulator lives in SMEM (no lane-sparse vector store).
        out_specs=pl.BlockSpec(memory_space=pltpu.MemorySpace.SMEM),
        compiler_params=pltpu.CompilerParams(
            dimension_semantics=("arbitrary",),          # sequential reduction
            vmem_limit_bytes=vmem_limit),
        cost_estimate=cost,
    )(feats, labels2d, proto_scaled)
    return out[0, 0]


def comp_loss_ref(features, prototypes, labels):
    """Pure-JAX reference mirroring the PyTorch forward."""
    norm = jnp.sqrt(jnp.sum(prototypes * prototypes, axis=1, keepdims=True))
    proto_n = prototypes / jnp.maximum(norm, NORM_EPS)
    logits = (features @ proto_n.T) / TEMPERATURE
    logits = logits - jnp.max(logits, axis=1, keepdims=True)
    log_prob = logits - jnp.log(jnp.sum(jnp.exp(logits), axis=1, keepdims=True))
    mask = jax.nn.one_hot(labels, prototypes.shape[0], dtype=jnp.float32)
    mean_log_prob_pos = jnp.sum(mask * log_prob, axis=1)
    return -(TEMPERATURE / BASE_TEMPERATURE) * jnp.mean(mean_log_prob_pos)


if __name__ == "__main__":
    # Small shapes consistent with the module (args.n_cls = 8).  B is NOT a
    # multiple of the 128-row tile so padding + masking is exercised.
    B, D, N_CLS = 12, 32, 8

    key = jax.random.PRNGKey(0)
    kf, kp, kl = jax.random.split(key, 3)

    # Features are typically already L2-normalized embeddings upstream.
    feats = jax.random.normal(kf, (B, D), dtype=jnp.float32)
    feats = feats / jnp.linalg.norm(feats, axis=1, keepdims=True)

    # "Parameters": class prototypes (C, D).
    prototypes = jax.random.normal(kp, (N_CLS, D), dtype=jnp.float32)

    labels = jax.random.randint(kl, (B,), 0, N_CLS, dtype=jnp.int32)

    loss = comp_loss(feats, prototypes, labels)
    loss = jax.block_until_ready(loss)

    ref = jax.block_until_ready(comp_loss_ref(feats, prototypes, labels))
    assert np.allclose(np.asarray(loss), np.asarray(ref), rtol=1e-4, atol=1e-4), (
        loss, ref)

    print("KERNEL_OK")
</pallas_src>

<mosaic_0001>
module attributes {stable_mosaic.version = 11 : i64} {
  func.func @_comp_loss_kernel(%arg0: i32, %arg1: memref<128x32xf32, #tpu.memory_space<vmem>>, %arg2: memref<1x128xi32, #tpu.memory_space<vmem>>, %arg3: memref<8x32xf32, #tpu.memory_space<vmem>>, %arg4: memref<1x1xf32, #tpu.memory_space<smem>>) attributes {dimension_semantics = [#tpu.dimension_semantics<arbitrary>], iteration_bounds = array<i64: 1>, scalar_prefetch = 0 : i64, scratch_operands = 0 : i64, tpu.core_type = #tpu.core_type<tc>, window_params = [{transform_indices = @transform_0, window_bounds = array<i64: 128, 32>}, {transform_indices = @transform_1, window_bounds = array<i64: 1, 128>}, {pipeline_mode = #tpu.pipeline_mode<synchronous>, transform_indices = @transform_2, window_bounds = array<i64: 8, 32>}, {transform_indices = @transform_3, window_bounds = array<i64: 1, 1>}]} {
    %c0_i32 = arith.constant 0 : i32
    %0 = arith.cmpi eq, %arg0, %c0_i32 : i32
    %1 = arith.extui %0 : i1 to i32
    %c0_i32_0 = arith.constant 0 : i32
    %2 = arith.cmpi ne, %1, %c0_i32_0 : i32
    scf.if %2 {
      %cst_17 = arith.constant 0.000000e+00 : f32
      %c0_18 = arith.constant 0 : index
      %c0_19 = arith.constant 0 : index
      %39 = memref.load %arg4[%c0_18, %c0_19] : memref<1x1xf32, #tpu.memory_space<smem>>
      memref.store %cst_17, %arg4[%c0_18, %c0_19] : memref<1x1xf32, #tpu.memory_space<smem>>
    } else {
    }
    %c0 = arith.constant 0 : index
    %c0_1 = arith.constant 0 : index
    %3 = vector.load %arg2[%c0, %c0_1] : memref<1x128xi32, #tpu.memory_space<vmem>>, vector<1x128xi32>
    %c0_2 = arith.constant 0 : index
    %c0_3 = arith.constant 0 : index
    %4 = vector.load %arg3[%c0_2, %c0_3] : memref<8x32xf32, #tpu.memory_space<vmem>>, vector<8x32xf32>
    %c0_4 = arith.constant 0 : index
    %c0_5 = arith.constant 0 : index
    %5 = vector.load %arg1[%c0_4, %c0_5] : memref<128x32xf32, #tpu.memory_space<vmem>>, vector<128x32xf32>
    %cst = arith.constant dense<0.000000e+00> : vector<8x128xf32>
    %6 = tpu.matmul %4, %5, %cst {dimension_numbers = #tpu.dot_dimension_numbers<[1], [1], [0], [0], [0, 0, 1, 0], [], []>} : vector<8x32xf32>, vector<128x32xf32>, vector<8x128xf32> -> vector<8x128xf32>
    %cst_6 = arith.constant dense<0xFF800000> : vector<128xf32>
    %7 = vector.multi_reduction <maximumf>, %6, %cst_6 [0] : vector<8x128xf32> to vector<128xf32>
    %8 = vector.shape_cast %7 : vector<128xf32> to vector<1x128xf32>
    %9 = vector.broadcast %8 : vector<1x128xf32> to vector<8x128xf32>
    %10 = arith.subf %6, %9 : vector<8x128xf32>
    %11 = math.exp %10 : vector<8x128xf32>
    %cst_7 = arith.constant dense<0.000000e+00> : vector<128xf32>
    %12 = vector.multi_reduction <add>, %11, %cst_7 [0] : vector<8x128xf32> to vector<128xf32>
    %13 = vector.shape_cast %12 : vector<128xf32> to vector<1x128xf32>
    %14 = math.log %13 : vector<1x128xf32>
    %15 = tpu.iota {dimensions = array<i32: 0>} : vector<8x128xi32>
    %16 = vector.broadcast %3 : vector<1x128xi32> to vector<8x128xi32>
    %17 = arith.cmpi eq, %16, %15 : vector<8x128xi32>
    %18 = arith.extui %17 : vector<8x128xi1> to vector<8x128xi32>
    %19 = arith.sitofp %18 : vector<8x128xi32> to vector<8x128xf32>
    %20 = arith.mulf %19, %10 : vector<8x128xf32>
    %cst_8 = arith.constant dense<0.000000e+00> : vector<128xf32>
    %21 = vector.multi_reduction <add>, %20, %cst_8 [0] : vector<8x128xf32> to vector<128xf32>
    %22 = vector.shape_cast %21 : vector<128xf32> to vector<1x128xf32>
    %23 = arith.subf %22, %14 : vector<1x128xf32>
    %c0_i32_9 = arith.constant 0 : i32
    %24 = vector.broadcast %c0_i32_9 : i32 to vector<1x128xi32>
    %25 = arith.cmpi sge, %3, %24 : vector<1x128xi32>
    %26 = arith.extui %25 : vector<1x128xi1> to vector<1x128xi32>
    %27 = arith.sitofp %26 : vector<1x128xi32> to vector<1x128xf32>
    %c0_10 = arith.constant 0 : index
    %c0_11 = arith.constant 0 : index
    %28 = memref.load %arg4[%c0_10, %c0_11] : memref<1x1xf32, #tpu.memory_space<smem>>
    %29 = arith.mulf %23, %27 : vector<1x128xf32>
    %30 = vector.shape_cast %29 : vector<1x128xf32> to vector<1x1x128xf32>
    %cst_12 = arith.constant dense<0.000000e+00> : vector<1xf32>
    %31 = vector.multi_reduction <add>, %30, %cst_12 [1, 2] : vector<1x1x128xf32> to vector<1xf32>
    %32 = vector.shape_cast %31 : vector<1xf32> to vector<1x1x1xf32>
    %33 = vector.extract %32[0, 0, 0] : f32 from vector<1x1x1xf32>
    %34 = arith.addf %28, %33 : f32
    %c0_13 = arith.constant 0 : index
    %c0_14 = arith.constant 0 : index
    %35 = memref.load %arg4[%c0_13, %c0_14] : memref<1x1xf32, #tpu.memory_space<smem>>
    memref.store %34, %arg4[%c0_13, %c0_14] : memref<1x1xf32, #tpu.memory_space<smem>>
    %c0_i32_15 = arith.constant 0 : i32
    %36 = arith.cmpi eq, %arg0, %c0_i32_15 : i32
    %37 = arith.extui %36 : i1 to i32
    %c0_i32_16 = arith.constant 0 : i32
    %38 = arith.cmpi ne, %37, %c0_i32_16 : i32
    scf.if %38 {
      %c0_17 = arith.constant 0 : index
      %c0_18 = arith.constant 0 : index
      %39 = memref.load %arg4[%c0_17, %c0_18] : memref<1x1xf32, #tpu.memory_space<smem>>
      %cst_19 = arith.constant -0.0833333358 : f32
      %40 = arith.mulf %39, %cst_19 : f32
      %c0_20 = arith.constant 0 : index
      %c0_21 = arith.constant 0 : index
      %41 = memref.load %arg4[%c0_20, %c0_21] : memref<1x1xf32, #tpu.memory_space<smem>>
      memref.store %40, %arg4[%c0_20, %c0_21] : memref<1x1xf32, #tpu.memory_space<smem>>
    } else {
    }
    return
  }
  func.func @transform_0(%arg0: i32) -> (i32, i32) {
    %c0_i32 = arith.constant 0 : i32
    %c0_i32_0 = arith.constant 0 : i32
    return %arg0, %c0_i32 : i32, i32
  }
  func.func @transform_1(%arg0: i32) -> (i32, i32) {
    %c0_i32 = arith.constant 0 : i32
    %c0_i32_0 = arith.constant 0 : i32
    return %c0_i32, %arg0 : i32, i32
  }
  func.func @transform_2(%arg0: i32) -> (i32, i32) {
    %c0_i32 = arith.constant 0 : i32
    %c0_i32_0 = arith.constant 0 : i32
    %c0_i32_1 = arith.constant 0 : i32
    return %c0_i32, %c0_i32_0 : i32, i32
  }
  func.func @transform_3(%arg0: i32) -> (i32, i32) {
    %c0_i32 = arith.constant 0 : i32
    %c0_i32_0 = arith.constant 0 : i32
    %c0_i32_1 = arith.constant 0 : i32
    return %c0_i32, %c0_i32_0 : i32, i32
  }
}

</mosaic_0001>

<bundles_post_ra>
// kernel: tpu_custom_call.1
= control target key start
LH: loop header
LB: loop body
LE: loop exit
PB: predicated region body
PF: predicated region fallthrough
CT: control target
= control target key end

     0   :  { %vm39_vm0 = vcmask 261120   ;;  %v324_v1 = vmov 0.0   ;;  %vm325_vm1 = vmmov 0   ;;  %s440_s0 = inlined_call_operand.vmem [shape: f32[128,32], index: 0, kind: input, shape index: {}]   ;;  %s441_s1 = inlined_call_operand.vmem [shape: s32[1,128], index: 1, kind: input, shape index: {}]   ;;  %s442_s2 = inlined_call_operand.vmem [shape: f32[8,32], index: 2, kind: input, shape index: {}]   ;;  %s443_s3 = inlined_call_operand.hbm [shape: f32[1,1], index: 3, kind: output, shape index: {}]  }
   0x1   :  { %v38_v0 = vld [vmem:[%s440_s0 + $0x78] sm:$0xff]  ;;  %269 = vmatprep.subr.mxu0 %v324_v1  ;;  %301 = vmatprep.mubr.msk.f32.mxu0 %vm325_vm1, %v324_v1  ;;  %v37_v2 = vld [vmem:[%s440_s0 + $0x70] sm:$0xff] }
   0x2   :  { %270 = vmatpush3.xpose.msk.msra.mxu0 %vm39_vm0, %v38_v0 }
   0x3   :  { %271 = vmatprep.subr.mxu0 %v324_v1 }
   0x4   :  { %8 = vsyncpa [#allocation3], 0  ;;  %v36_v3 = vld [vmem:[%s440_s0 + $0x68] sm:$0xff]  ;;  %v35_v4 = vld [vmem:[%s440_s0 + $0x60] sm:$0xff]  ;;  %v178_v26 = vlaneseq  ;;  %vm200_vm4 = vcmask 1040384   ;;  %s326_s20 = smov [#allocation2]  }
   0x5   :  { %v34_v5 = vld [vmem:[%s440_s0 + $0x58] sm:$0xff]  ;;  %v33_v6 = vld [vmem:[%s440_s0 + $0x50] sm:$0xff]  ;;  %v32_v7 = vld [vmem:[%s440_s0 + $0x48] sm:$0xff] }
   0x6   :  { %272 = vmatpush3.xpose.msk.msra.mxu0 %vm39_vm0, %v37_v2  ;;  %v31_v8 = vld [vmem:[%s440_s0 + $0x40] sm:$0xff]  ;;  %v30_v9 = vld [vmem:[%s440_s0 + $0x38] sm:$0xff]  ;;  %v29_v10 = vld [vmem:[%s440_s0 + $0x30] sm:$0xff]  ;;  %v179_v29 = vshrl.u32 %v178_v26, 7 }
   0x7   :  { %273 = vmatprep.subr.mxu0 %v324_v1  ;;  %v28_v11 = vld [vmem:[%s440_s0 + $0x28] sm:$0xff]  ;;  %v27_v12 = vld [vmem:[%s440_s0 + $0x20] sm:$0xff]  ;;  %v26_v13 = vld [vmem:[%s440_s0 + $0x18] sm:$0xff] }
   0x8   :  { %v25_v14 = vld [vmem:[%s440_s0 + $0x10] sm:$0xff]  ;;  %v24_v15 = vld [vmem:[%s440_s0 + $0x8] sm:$0xff]  ;;  %v23_v16 = vld [vmem:[%s440_s0] sm:$0xff]  ;;  %v182_v30 = vsub.s32 0, %v179_v29 }
   0x9   :  { %v22_v17 = vld [vmem:[%s442_s2] sm:$0xff] }
   0xa   :  { %274 = vmatpush3.xpose.msk.msra.mxu0 %vm39_vm0, %v36_v3  ;;  %v21_v31 = vld [vmem:[%s441_s1] sm:$0x1] }
   0xb   :  { %275 = vmatprep.subr.mxu0 %v324_v1  ;;  %v183_v32 = vrot.slane %v21_v31, %v182_v30  ;;  %vm195_vm3 = vcmp.ge.s32.totalorder %v21_v31, 0 }
   0xc   :  { %v251_v50 = vsel %vm195_vm3, 1.0, %v324_v1 }
   0xd   :  { %vm184_vm2 = vcmp.eq.s32.totalorder %v183_v32, %v179_v29 }
   0xe   :  { %276 = vmatpush3.xpose.msk.msra.mxu0 %vm39_vm0, %v35_v4  ;;  %v250_v34 = vsel %vm184_vm2, 1.0, %v324_v1 }
   0xf   :  { %277 = vmatprep.subr.mxu0 %v324_v1 }
  0x12   :  { %278 = vmatpush3.xpose.msk.msra.mxu0 %vm39_vm0, %v34_v5 }
  0x13   :  { %279 = vmatprep.subr.mxu0 %v324_v1 }
  0x16   :  { %280 = vmatpush3.xpose.msk.msra.mxu0 %vm39_vm0, %v33_v6 }
  0x17   :  { %281 = vmatprep.subr.mxu0 %v324_v1 }
  0x1a   :  { %282 = vmatpush3.xpose.msk.msra.mxu0 %vm39_vm0, %v32_v7 }
  0x1b   :  { %283 = vmatprep.subr.mxu0 %v324_v1 }
  0x1e   :  { %284 = vmatpush3.xpose.msk.msra.mxu0 %vm39_vm0, %v31_v8 }
  0x1f   :  { %285 = vmatprep.subr.mxu0 %v324_v1 }
  0x22   :  { %286 = vmatpush3.xpose.msk.msra.mxu0 %vm39_vm0, %v30_v9 }
  0x23   :  { %287 = vmatprep.subr.mxu0 %v324_v1 }
  0x26   :  { %288 = vmatpush3.xpose.msk.msra.mxu0 %vm39_vm0, %v29_v10 }
  0x27   :  { %289 = vmatprep.subr.mxu0 %v324_v1 }
  0x2a   :  { %290 = vmatpush3.xpose.msk.msra.mxu0 %vm39_vm0, %v28_v11 }
  0x2b   :  { %291 = vmatprep.subr.mxu0 %v324_v1 }
  0x2e   :  { %292 = vmatpush3.xpose.msk.msra.mxu0 %vm39_vm0, %v27_v12 }
  0x2f   :  { %293 = vmatprep.subr.mxu0 %v324_v1 }
  0x32   :  { %294 = vmatpush3.xpose.msk.msra.mxu0 %vm39_vm0, %v26_v13 }
  0x33   :  { %295 = vmatprep.subr.mxu0 %v324_v1 }
  0x36   :  { %296 = vmatpush3.xpose.msk.msra.mxu0 %vm39_vm0, %v25_v14 }
  0x37   :  { %297 = vmatprep.subr.mxu0 %v324_v1 }
  0x3a   :  { %298 = vmatpush3.xpose.msk.msra.mxu0 %vm39_vm0, %v24_v15 }
  0x3b   :  { %299 = vmatprep.subr.mxu0 %v324_v1 }
  0x3e   :  { %300 = vmatpush3.xpose.msk.msra.mxu0 %vm39_vm0, %v23_v16 }
  0x41   :  { %302 = vmatmul.mubr.msk.f32.vlgmr.msra.gmra.mxu0 %vm39_vm0, %v22_v17 }
 0x101   :  { %v157_v18 = vpop.f32.mrf.mxu0 }
 0x102   :  { %v161_v19 = vrot.slane %v157_v18, 4 }
 0x103   :  { %v303_v20 = vpop.f32.mrf.mxu0 }
 0x104   :  { %v162_v21 = vmax.f32 %v157_v18, %v161_v19 }
 0x106   :  { %v163_v22 = vrot.slane %v162_v21, 2 }
 0x108   :  { %v164_v23 = vmax.f32 %v162_v21, %v163_v22 }
 0x10a   :  { %v165_v24 = vrot.slane %v164_v23, 1 }
 0x10c   :  { %v166_v25 = vmax.f32 %v164_v23, %v165_v24 }
 0x10e   :  { %v167_v27 = vsub.f32 %v157_v18, %v166_v25 }
 0x110   :  { %v168_v28 = vmul.f32 1.442695, %v167_v27  ;;  %v187_v37 = vmul.f32 %v250_v34, %v167_v27 }
 0x112   :  { %310 = vpow2.f32 %v168_v28  ;;  %v188_v40 = vrot.slane %v187_v37, 4 }
 0x114   :  { %v189_v43 = vadd.f32 %v188_v40, %v187_v37 }
 0x116   :  { %v190_v44 = vrot.slane %v189_v43, 2 }
 0x118   :  { %v191_v45 = vadd.f32 %v190_v44, %v189_v43 }
 0x11a   :  { %v192_v46 = vrot.slane %v191_v45, 1 }
 0x11c   :  { %v193_v49 = vadd.f32 %v192_v46, %v191_v45 }
 0x11f   :  { %v311_v33 = vpop.eup %310 }
 0x120   :  { %v170_v35 = vrot.slane %v311_v33, 4 }
 0x122   :  { %v171_v36 = vadd.f32 %v311_v33, %v170_v35 }
 0x124   :  { %v172_v38 = vrot.slane %v171_v36, 2 }
 0x126   :  { %v173_v39 = vadd.f32 %v172_v38, %v171_v36 }
 0x128   :  { %v174_v41 = vrot.slane %v173_v39, 1 }
 0x12a   :  { %v175_v42 = vadd.f32 %v174_v41, %v173_v39 }
 0x12c   :  { %312 = vlog2.f32 %v175_v42 }
 0x139   :  { %v313_v47 = vpop.eup %312 }
 0x13a   :  { %v177_v48 = vmul.f32 0.6931472, %v313_v47 }
 0x13c   :  { %v194_v51 = vsub.f32 %v193_v49, %v177_v48 }
 0x13e   :  { %v199_v52 = vmul.f32 %v251_v50, %v194_v51 }
 0x140   :  { %v201_v53 = vsel %vm200_vm4, %v199_v52, 0.0 }
 0x141   :  { %202 = vadd.xlane.f32.xlu0 %v201_v53 }
 0x1ca   :  { %v203_v54 = vpop.xlane.xlu0 %202 }
 0x1cb   :  { %v204_v55 = vrot.slane %v203_v54, 4 }
 0x1cd   :  { %v205_v56 = vadd.f32 %v204_v55, %v203_v54 }
 0x1cf   :  { %v206_v57 = vrot.slane %v205_v56, 2 }
 0x1d1   :  { %v207_v58 = vadd.f32 %v206_v57, %v205_v56 }
 0x1d3   :  { %v208_v59 = vrot.slane %v207_v58, 1 }
 0x1d5   :  { %v209_v60 = vadd.f32 %v208_v59, %v207_v58 }
 0x1d7   :  { %304 = vpush %v209_v60 }
 0x208   :  { %s305_s1 = spop %304 }
 0x209   :  { %s218_s2 = smul.f32 -0.083333336, %s305_s1 }
 0x20b   :  { %219 = sst [smem:[#allocation2]] %s218_s2 }
 0x20c   :  { %227 = dma.smem_to_hbm %s326_s20, 16, %s443_s3, [#allocation3]  }
 0x20d   :  { %322 = dma.done.wait [#allocation3], 16  }
 0x20e   :  { %323 = vsyncadd [#allocation3], 4294967280 }
 0x20f   :  { %231 = sfence }
 0x210   :  { %232 = vsyncpa [#allocation3], 1 }

</bundles_post_ra>
